<compile_context>
chip_gen: v7x
topology: tpu7x:2x2x1
jax: 0.10.0
libtpu: 0.0.40
codegen_flags: <defaults>
</compile_context>

<pallas_src>
import functools
import math

import jax
import jax.numpy as jnp
from jax import lax
from jax.experimental import pallas as pl
from jax.experimental.pallas import tpu as pltpu

_SUBLANES = 8
_LANES = 128
_MIN_CHUNK = _SUBLANES * _LANES        # 1024-element minimal lane-dense slab
_TILE_ELEMS = 1024 * 1024              # 1M f32 -> 4 MiB per output block


def _erfinv_giles(x):
    """Giles (2010) single-precision erfinv.

    Pure polynomial (no divisions): one log per element, plus one sqrt that
    only feeds the rarely-selected tail branch of a branchless jnp.where.
    Standard normal = sqrt(2) * erfinv(2U - 1).
    """
    w = -jnp.log(jnp.float32(1.0) - x * x)

    # Central branch (w < 5): 8 FMAs.
    wc = w - jnp.float32(2.5)
    pc = jnp.float32(2.81022636e-08)
    pc = jnp.float32(3.43273939e-07) + pc * wc
    pc = jnp.float32(-3.5233877e-06) + pc * wc
    pc = jnp.float32(-4.39150654e-06) + pc * wc
    pc = jnp.float32(0.00021858087) + pc * wc
    pc = jnp.float32(-0.00125372503) + pc * wc
    pc = jnp.float32(-0.00417768164) + pc * wc
    pc = jnp.float32(0.246640727) + pc * wc
    pc = jnp.float32(1.50140941) + pc * wc

    # Tail branch (w >= 5): 8 FMAs + sqrt, keeps the full Gaussian range.
    wt = jnp.sqrt(w) - jnp.float32(3.0)
    pt = jnp.float32(-0.000200214257)
    pt = jnp.float32(0.000100950558) + pt * wt
    pt = jnp.float32(0.00134934322) + pt * wt
    pt = jnp.float32(-0.00367342844) + pt * wt
    pt = jnp.float32(0.00573950773) + pt * wt
    pt = jnp.float32(-0.0076224613) + pt * wt
    pt = jnp.float32(0.00943887047) + pt * wt
    pt = jnp.float32(1.00167406) + pt * wt
    pt = jnp.float32(2.83297682) + pt * wt

    p = jnp.where(w < jnp.float32(5.0), pc, pt)
    return p * x


def _gaussian_noise_kernel(seed_ref, params_ref, x_ref, o_ref, *, use_hw_prng):
    mean = params_ref[0]
    std_sqrt2 = params_ref[1]          # std * sqrt(2), pre-folded in wrapper
    shape = x_ref.shape

    if use_hw_prng:
        # Hardware PRNG: one seed per tile -> independent streams per tile.
        pltpu.prng_seed(seed_ref[0], pl.program_id(0))
        bits = pltpu.prng_random_bits(shape).astype(jnp.uint32)
    else:
        # Portable counter-hash fallback (non-TPU backends / interpret mode).
        r = lax.broadcasted_iota(jnp.int32, shape, 0).astype(jnp.uint32)
        c = lax.broadcasted_iota(jnp.int32, shape, 1).astype(jnp.uint32)
        salt = (seed_ref[0].astype(jnp.uint32) * jnp.uint32(0x85EBCA6B)
                + pl.program_id(0).astype(jnp.uint32) * jnp.uint32(0x27D4EB2F)
                + jnp.uint32(0x9E3779B9))
        k = (r * jnp.uint32(0x9E3779B1)) ^ (c * jnp.uint32(0xC2B2AE35)) ^ salt
        k = k ^ (k >> 15)
        k = k * jnp.uint32(0x2C1B3C6D)
        k = k ^ (k >> 12)
        k = k * jnp.uint32(0x297A2D39)
        bits = k ^ (k >> 15)

    # 24-bit uniform mapped to (-1, 1), then erfinv -> standard normal.
    u24 = (bits >> 8).astype(jnp.int32).astype(jnp.float32)
    xu = u24 * jnp.float32(1.0 / 8388608.0) + jnp.float32(1.0 / 16777216.0 - 1.0)
    z = _erfinv_giles(xu)

    o_ref[...] = x_ref[...].astype(jnp.float32) + (mean + std_sqrt2 * z)


def gaussian_noise_layer(x, seed=0, mean=0.0, std=1.0, *, use_hw_prng=None):
    """JAX/Pallas equivalent of Gaussian_Noise_Layer.forward.

    x:    any-shaped array (e.g. NCHW activations), any dtype.
    seed: int32 seed (PyTorch uses np.random global state; here randomness is
          an explicit seeded TPU hardware PRNG stream).
    """
    if use_hw_prng is None:
        use_hw_prng = jax.default_backend() == "tpu"

    orig_shape = x.shape
    total = int(x.size)
    flat = jnp.reshape(x, (-1,))

    # Widest lane-dense width that tiles the data with rows % 8 == 0.
    width = None
    for w in (1024, 512, 256, 128):
        if total % (_SUBLANES * w) == 0:
            width = w
            break
    if width is not None:
        main = total
    else:
        # Awkward size: run the bulk through the kernel, handle the tiny
        # (<1024-element) remainder outside — no full-tensor pad copy.
        width = _LANES
        main = (total // _MIN_CHUNK) * _MIN_CHUNK

    out_parts = []

    if main > 0:
        rows = main // width
        x2d = flat[:main].reshape(rows, width)

        tile_rows = min(rows, max(_SUBLANES, _TILE_ELEMS // width))
        # Ensure >= 2 grid tiles for medium tensors so v7x's two TensorCores
        # both get work (grid axis is marked "parallel").
        if tile_rows >= rows and rows >= 2 * _SUBLANES:
            half = (rows + 1) // 2
            tile_rows = ((half + _SUBLANES - 1) // _SUBLANES) * _SUBLANES
        grid = (pl.cdiv(rows, tile_rows),)

        seed_arr = jnp.asarray([seed], dtype=jnp.int32)
        params = jnp.asarray([mean, std * math.sqrt(2.0)], dtype=jnp.float32)

        cost = pl.CostEstimate(
            flops=30 * main,
            transcendentals=2 * main,
            bytes_accessed=main * x.dtype.itemsize + main * 4,
        )

        kernel = functools.partial(_gaussian_noise_kernel,
                                   use_hw_prng=use_hw_prng)

        out2d = pl.pallas_call(
            kernel,
            out_shape=jax.ShapeDtypeStruct((rows, width), jnp.float32),
            grid=grid,
            in_specs=[
                pl.BlockSpec(memory_space=pltpu.SMEM),            # seed
                pl.BlockSpec(memory_space=pltpu.SMEM),            # [mean, std*sqrt2]
                pl.BlockSpec((tile_rows, width), lambda i: (i, 0)),
            ],
            out_specs=pl.BlockSpec((tile_rows, width), lambda i: (i, 0)),
            compiler_params=pltpu.CompilerParams(
                dimension_semantics=("parallel",),
                # 2x(in+out) 4 MiB buffers + headroom; legal on v5e/v6e/v7x.
                vmem_limit_bytes=40 * 1024 * 1024,
            ),
            cost_estimate=cost,
        )(seed_arr, params, x2d)
        out_parts.append(out2d.reshape(-1))

    rem = total - main
    if rem > 0:
        # Sub-(8x128) tail processed outside the kernel (negligible work).
        tail = flat[main:].astype(jnp.float32)
        tail_noise = mean + std * jax.random.normal(
            jax.random.PRNGKey(int(seed) ^ 0x5DEECE66), (rem,),
            dtype=jnp.float32)
        out_parts.append(tail + tail_noise)

    out = out_parts[0] if len(out_parts) == 1 else jnp.concatenate(out_parts)
    return out.reshape(orig_shape)


if __name__ == "__main__":
    key = jax.random.PRNGKey(0)
    # Small NCHW input consistent with the module's usage on conv feature maps.
    x = jax.random.normal(key, (2, 4, 16, 16), dtype=jnp.float32)

    y = gaussian_noise_layer(x, seed=0, mean=0.0, std=1.0)
    y = jax.block_until_ready(y)

    # Sanity checks: shape/dtype preserved, noise injected, roughly N(0, 1).
    assert y.shape == x.shape
    assert y.dtype == jnp.float32
    diff = y - x  # exactly the injected noise
    assert bool(jnp.any(jnp.abs(diff) > 0.0))
    assert abs(float(jnp.mean(diff))) < 0.25
    assert 0.6 < float(jnp.std(diff)) < 1.4

    print("KERNEL_OK")
</pallas_src>

<mosaic_0001>
module attributes {stable_mosaic.version = 11 : i64} {
  func.func @_gaussian_noise_kernel(%arg0: i32, %arg1: memref<1xi32, #tpu.memory_space<smem>>, %arg2: memref<2xf32, #tpu.memory_space<smem>>, %arg3: memref<8x256xf32, #tpu.memory_space<vmem>>, %arg4: memref<8x256xf32, #tpu.memory_space<vmem>>) attributes {dimension_semantics = [#tpu.dimension_semantics<parallel>], iteration_bounds = array<i64: 1>, scalar_prefetch = 0 : i64, scratch_operands = 0 : i64, tpu.core_type = #tpu.core_type<tc>, window_params = [{transform_indices = @transform_0, window_bounds = array<i64: 1>}, {transform_indices = @transform_1, window_bounds = array<i64: 2>}, {transform_indices = @transform_2, window_bounds = array<i64: 8, 256>}, {transform_indices = @transform_3, window_bounds = array<i64: 8, 256>}]} {
    %c0 = arith.constant 0 : index
    %0 = memref.load %arg2[%c0] : memref<2xf32, #tpu.memory_space<smem>>
    %c1 = arith.constant 1 : index
    %1 = memref.load %arg2[%c1] : memref<2xf32, #tpu.memory_space<smem>>
    %2 = tpu.iota {dimensions = array<i32: 0>} : vector<8x256xi32>
    %3 = tpu.iota {dimensions = array<i32: 1>} : vector<8x256xi32>
    %c0_0 = arith.constant 0 : index
    %4 = memref.load %arg1[%c0_0] : memref<1xi32, #tpu.memory_space<smem>>
    %c-2048144789_i32 = arith.constant -2048144789 : i32
    %5 = arith.muli %4, %c-2048144789_i32 : i32
    %c668265263_i32 = arith.constant 668265263 : i32
    %6 = arith.muli %arg0, %c668265263_i32 : i32
    %7 = arith.addi %5, %6 : i32
    %c-1640531527_i32 = arith.constant -1640531527 : i32
    %8 = arith.addi %7, %c-1640531527_i32 : i32
    %c-1640531535_i32 = arith.constant -1640531535 : i32
    %9 = vector.broadcast %c-1640531535_i32 : i32 to vector<8x256xi32>
    %10 = arith.muli %2, %9 : vector<8x256xi32>
    %c-1028477387_i32 = arith.constant -1028477387 : i32
    %11 = vector.broadcast %c-1028477387_i32 : i32 to vector<8x256xi32>
    %12 = arith.muli %3, %11 : vector<8x256xi32>
    %13 = arith.xori %10, %12 : vector<8x256xi32>
    %14 = vector.broadcast %8 : i32 to vector<8x256xi32>
    %15 = arith.xori %13, %14 : vector<8x256xi32>
    %c15_i32 = arith.constant 15 : i32
    %16 = vector.broadcast %c15_i32 : i32 to vector<8x256xi32>
    %17 = arith.shrui %15, %16 : vector<8x256xi32>
    %18 = arith.xori %15, %17 : vector<8x256xi32>
    %c739982445_i32 = arith.constant 739982445 : i32
    %19 = vector.broadcast %c739982445_i32 : i32 to vector<8x256xi32>
    %20 = arith.muli %18, %19 : vector<8x256xi32>
    %c12_i32 = arith.constant 12 : i32
    %21 = vector.broadcast %c12_i32 : i32 to vector<8x256xi32>
    %22 = arith.shrui %20, %21 : vector<8x256xi32>
    %23 = arith.xori %20, %22 : vector<8x256xi32>
    %c695872825_i32 = arith.constant 695872825 : i32
    %24 = vector.broadcast %c695872825_i32 : i32 to vector<8x256xi32>
    %25 = arith.muli %23, %24 : vector<8x256xi32>
    %c15_i32_1 = arith.constant 15 : i32
    %26 = vector.broadcast %c15_i32_1 : i32 to vector<8x256xi32>
    %27 = arith.shrui %25, %26 : vector<8x256xi32>
    %28 = arith.xori %25, %27 : vector<8x256xi32>
    %c8_i32 = arith.constant 8 : i32
    %29 = vector.broadcast %c8_i32 : i32 to vector<8x256xi32>
    %30 = arith.shrui %28, %29 : vector<8x256xi32>
    %31 = arith.sitofp %30 : vector<8x256xi32> to vector<8x256xf32>
    %cst = arith.constant 1.1920929E-7 : f32
    %32 = vector.broadcast %cst : f32 to vector<8x256xf32>
    %33 = arith.mulf %31, %32 : vector<8x256xf32>
    %cst_2 = arith.constant -0.99999994 : f32
    %34 = vector.broadcast %cst_2 : f32 to vector<8x256xf32>
    %35 = arith.addf %33, %34 : vector<8x256xf32>
    %36 = arith.mulf %35, %35 : vector<8x256xf32>
    %cst_3 = arith.constant 1.000000e+00 : f32
    %37 = vector.broadcast %cst_3 : f32 to vector<8x256xf32>
    %38 = arith.subf %37, %36 : vector<8x256xf32>
    %39 = math.log %38 : vector<8x256xf32>
    %cst_4 = arith.constant 0.000000e+00 : f32
    %40 = vector.broadcast %cst_4 : f32 to vector<8x256xf32>
    %41 = arith.subf %40, %39 : vector<8x256xf32>
    %cst_5 = arith.constant 2.500000e+00 : f32
    %42 = vector.broadcast %cst_5 : f32 to vector<8x256xf32>
    %43 = arith.subf %41, %42 : vector<8x256xf32>
    %cst_6 = arith.constant 2.81022636E-8 : f32
    %44 = vector.broadcast %cst_6 : f32 to vector<8x256xf32>
    %45 = arith.mulf %44, %43 : vector<8x256xf32>
    %cst_7 = arith.constant 3.43273939E-7 : f32
    %46 = vector.broadcast %cst_7 : f32 to vector<8x256xf32>
    %47 = arith.addf %46, %45 : vector<8x256xf32>
    %48 = arith.mulf %47, %43 : vector<8x256xf32>
    %cst_8 = arith.constant -3.5233877E-6 : f32
    %49 = vector.broadcast %cst_8 : f32 to vector<8x256xf32>
    %50 = arith.addf %49, %48 : vector<8x256xf32>
    %51 = arith.mulf %50, %43 : vector<8x256xf32>
    %cst_9 = arith.constant -4.39150654E-6 : f32
    %52 = vector.broadcast %cst_9 : f32 to vector<8x256xf32>
    %53 = arith.addf %52, %51 : vector<8x256xf32>
    %54 = arith.mulf %53, %43 : vector<8x256xf32>
    %cst_10 = arith.constant 2.1858087E-4 : f32
    %55 = vector.broadcast %cst_10 : f32 to vector<8x256xf32>
    %56 = arith.addf %55, %54 : vector<8x256xf32>
    %57 = arith.mulf %56, %43 : vector<8x256xf32>
    %cst_11 = arith.constant -0.00125372503 : f32
    %58 = vector.broadcast %cst_11 : f32 to vector<8x256xf32>
    %59 = arith.addf %58, %57 : vector<8x256xf32>
    %60 = arith.mulf %59, %43 : vector<8x256xf32>
    %cst_12 = arith.constant -0.00417768164 : f32
    %61 = vector.broadcast %cst_12 : f32 to vector<8x256xf32>
    %62 = arith.addf %61, %60 : vector<8x256xf32>
    %63 = arith.mulf %62, %43 : vector<8x256xf32>
    %cst_13 = arith.constant 0.246640727 : f32
    %64 = vector.broadcast %cst_13 : f32 to vector<8x256xf32>
    %65 = arith.addf %64, %63 : vector<8x256xf32>
    %66 = arith.mulf %65, %43 : vector<8x256xf32>
    %cst_14 = arith.constant 1.50140941 : f32
    %67 = vector.broadcast %cst_14 : f32 to vector<8x256xf32>
    %68 = arith.addf %67, %66 : vector<8x256xf32>
    %69 = math.sqrt %41 : vector<8x256xf32>
    %cst_15 = arith.constant 3.000000e+00 : f32
    %70 = vector.broadcast %cst_15 : f32 to vector<8x256xf32>
    %71 = arith.subf %69, %70 : vector<8x256xf32>
    %cst_16 = arith.constant -2.00214257E-4 : f32
    %72 = vector.broadcast %cst_16 : f32 to vector<8x256xf32>
    %73 = arith.mulf %72, %71 : vector<8x256xf32>
    %cst_17 = arith.constant 1.00950558E-4 : f32
    %74 = vector.broadcast %cst_17 : f32 to vector<8x256xf32>
    %75 = arith.addf %74, %73 : vector<8x256xf32>
    %76 = arith.mulf %75, %71 : vector<8x256xf32>
    %cst_18 = arith.constant 0.00134934322 : f32
    %77 = vector.broadcast %cst_18 : f32 to vector<8x256xf32>
    %78 = arith.addf %77, %76 : vector<8x256xf32>
    %79 = arith.mulf %78, %71 : vector<8x256xf32>
    %cst_19 = arith.constant -0.00367342844 : f32
    %80 = vector.broadcast %cst_19 : f32 to vector<8x256xf32>
    %81 = arith.addf %80, %79 : vector<8x256xf32>
    %82 = arith.mulf %81, %71 : vector<8x256xf32>
    %cst_20 = arith.constant 0.00573950773 : f32
    %83 = vector.broadcast %cst_20 : f32 to vector<8x256xf32>
    %84 = arith.addf %83, %82 : vector<8x256xf32>
    %85 = arith.mulf %84, %71 : vector<8x256xf32>
    %cst_21 = arith.constant -0.0076224613 : f32
    %86 = vector.broadcast %cst_21 : f32 to vector<8x256xf32>
    %87 = arith.addf %86, %85 : vector<8x256xf32>
    %88 = arith.mulf %87, %71 : vector<8x256xf32>
    %cst_22 = arith.constant 0.00943887047 : f32
    %89 = vector.broadcast %cst_22 : f32 to vector<8x256xf32>
    %90 = arith.addf %89, %88 : vector<8x256xf32>
    %91 = arith.mulf %90, %71 : vector<8x256xf32>
    %cst_23 = arith.constant 1.00167406 : f32
    %92 = vector.broadcast %cst_23 : f32 to vector<8x256xf32>
    %93 = arith.addf %92, %91 : vector<8x256xf32>
    %94 = arith.mulf %93, %71 : vector<8x256xf32>
    %cst_24 = arith.constant 2.83297682 : f32
    %95 = vector.broadcast %cst_24 : f32 to vector<8x256xf32>
    %96 = arith.addf %95, %94 : vector<8x256xf32>
    %cst_25 = arith.constant 5.000000e+00 : f32
    %97 = vector.broadcast %cst_25 : f32 to vector<8x256xf32>
    %98 = arith.cmpf olt, %41, %97 : vector<8x256xf32>
    %99 = arith.select %98, %68, %96 : vector<8x256xi1>, vector<8x256xf32>
    %100 = arith.mulf %99, %35 : vector<8x256xf32>
    %c0_26 = arith.constant 0 : index
    %c0_27 = arith.constant 0 : index
    %101 = vector.load %arg3[%c0_26, %c0_27] : memref<8x256xf32, #tpu.memory_space<vmem>>, vector<8x256xf32>
    %102 = vector.broadcast %1 : f32 to vector<8x256xf32>
    %103 = arith.mulf %102, %100 : vector<8x256xf32>
    %104 = vector.broadcast %0 : f32 to vector<8x256xf32>
    %105 = arith.addf %104, %103 : vector<8x256xf32>
    %106 = arith.addf %101, %105 : vector<8x256xf32>
    %c0_28 = arith.constant 0 : index
    %c0_29 = arith.constant 0 : index
    %107 = vector.load %arg4[%c0_28, %c0_29] : memref<8x256xf32, #tpu.memory_space<vmem>>, vector<8x256xf32>
    tpu.vector_store %arg4[%c0_28, %c0_29], %106 {strides = array<i32>} : memref<8x256xf32, #tpu.memory_space<vmem>>, vector<8x256xf32>,
    return
  }
  func.func @transform_0(%arg0: i32) -> i32 {
    %c0_i32 = arith.constant 0 : i32
    %c0_i32_0 = arith.constant 0 : i32
    return %c0_i32 : i32
  }
  func.func @transform_1(%arg0: i32) -> i32 {
    %c0_i32 = arith.constant 0 : i32
    %c0_i32_0 = arith.constant 0 : i32
    return %c0_i32 : i32
  }
  func.func @transform_2(%arg0: i32) -> (i32, i32) {
    %c0_i32 = arith.constant 0 : i32
    %c0_i32_0 = arith.constant 0 : i32
    return %arg0, %c0_i32 : i32, i32
  }
  func.func @transform_3(%arg0: i32) -> (i32, i32) {
    %c0_i32 = arith.constant 0 : i32
    %c0_i32_0 = arith.constant 0 : i32
    return %arg0, %c0_i32 : i32, i32
  }
}

</mosaic_0001>

<bundles_post_ra>
// kernel: tpu_custom_call.1
= control target key start
LH: loop header
LB: loop body
LE: loop exit
PB: predicated region body
PF: predicated region fallthrough
CT: control target
= control target key end

     0   :  { %9 = vsyncpa [#allocation6], 0  ;;  %s392_s0 = inlined_call_operand.<no memory space> [shape: s32[1], index: 0, kind: input, shape index: {}]   ;;  %s393_s1 = inlined_call_operand.vmem [shape: f32[2], index: 1, kind: input, shape index: {}]   ;;  %s394_s2 = inlined_call_operand.hbm [shape: f32[8,256], index: 2, kind: input, shape index: {}]   ;;  %s395_s3 = inlined_call_operand.hbm [shape: f32[8,256], index: 3, kind: output, shape index: {}]  }
   0x1   :  { %10 = vsyncpa [#allocation4], 0 }
   0x2   :  { %11 = vsyncpa [#allocation5], 0  ;;  %s20_s14 = sshll.u32 %s393_s1, 4  ;;  %s21_s14 = int_to_ptr.vmem [resolvable:$true] %s20_s14 }
   0x3   :  { %s227_s15 = scalar_lea.vmem %s21_s14, 16  ;;  %p232_p1 = scmp.lt.s32.totalorder %s21_s14, %s21_s14 }
   0x4   :  { %p228_p0 = scmp.ne.s32.totalorder %s21_s14, %s227_s15  ;;  %p233_p2 = scmp.lt.s32.totalorder %s227_s15, %s227_s15 }
   0x6   :  { %p234_p3 = por %p233_p2, %p232_p1 }
   0x8   :  { %p235_p4 = pnand %p234_p3, %p228_p0 }
   0xa   :  { %238 = shalt.err (!%p235_p4)
}
   0xb   :  { %s289_s16 = smov [#allocation3]   ;;  %s290_s17 = smov [#allocation7]  }
   0xc   :  { %23 = dma.vmem_to_smem %s21_s14, 16, %s289_s16, [#allocation6]  }
   0xd   :  { %s30_s18 = sshll.u32 %s290_s17, 4  ;;  %s239_s21 = scalar_lea.hbm %s394_s2, 256  ;;  %s31_s18 = int_to_ptr.vmem [resolvable:$true] %s30_s18 }
   0xe   :  { %p240_p5 = scmp.ne.s32.totalorder %s394_s2, %s239_s21  ;;  %p243_p6 = scmp.lt.u32.totalorder %s239_s21, %s394_s2 }
  0x10   :  { %p245_p7 = pnand %p243_p6, %p240_p5 }
  0x12   :  { %248 = shalt.err (!%p245_p7)
}
  0x13   :  { %s249_s25 = scalar_lea.vmem %s31_s18, 256  ;;  %p254_p9 = scmp.lt.s32.totalorder %s31_s18, %s31_s18 }
  0x14   :  { %p250_p8 = scmp.ne.s32.totalorder %s31_s18, %s249_s25  ;;  %p255_p10 = scmp.lt.s32.totalorder %s249_s25, %s249_s25 }
  0x16   :  { %p256_p11 = por %p255_p10, %p254_p9 }
  0x18   :  { %p257_p12 = pnand %p256_p11, %p250_p8 }
  0x1a   :  { %260 = shalt.err (!%p257_p12)
}
  0x1b   :  { %33 = dma.hbm_to_vmem [thread:$0]  %s394_s2, 256, %s31_s18, [#allocation4]  }
  0x1c   :  { %283 = dma.done.wait [#allocation6], 16  }
  0x1d   :  { %284 = vsyncadd [#allocation6], 4294967280 }
  0x1e   :  { %285 = dma.done.wait [#allocation4], 256  }
  0x1f   :  { %286 = vsyncadd [#allocation4], 4294967040 }
  0x20   :  { %40 = sfence }
  0x21   :  { %v43_v0 = vlaneseq  ;;  %s49_s30 = smul.u32 2246822507, %s392_s0  ;;  %s211_s0 = sld [smem:[#allocation3 + $0x1]] }
  0x22   :  { %s41_s2 = sld [smem:[#allocation3]]  ;;  %s291_s5 = smov [#allocation8]  }
  0x23   :  { %v44_v1 = vshrl.u32 %v43_v0, 7  ;;  %v46_v2 = vand.u32 127, %v43_v0  ;;  %s52_s4 = sadd.s32 2654435769, %s49_s30  ;;  %s201_s6 = sshll.u32 %s291_s5, 4  ;;  %s202_s6 = int_to_ptr.vmem [resolvable:$true] %s201_s6 }
  0x24   :  { %v58_v6 = vstv %s52_s4  ;;  %s261_s7 = scalar_lea.vmem %s202_s6, 256  ;;  %p266_p0 = scmp.lt.s32.totalorder %s202_s6, %s202_s6 }
  0x25   :  { %v53_v3 = vmul.u32 2654435761, %v44_v1  ;;  %v54_v4 = vmul.u32 3266489909, %v46_v2  ;;  %v47_v5 = vadd.s32 128, %v46_v2  ;;  %p262_p13 = scmp.ne.s32.totalorder %s202_s6, %s261_s7  ;;  %p267_p1 = scmp.lt.s32.totalorder %s261_s7, %s261_s7 }
  0x27   :  { %v56_v7 = vxor.u32 %v54_v4, %v53_v3  ;;  %v55_v8 = vmul.u32 3266489909, %v47_v5  ;;  %p268_p2 = por %p267_p1, %p266_p0 }
  0x29   :  { %v59_v9 = vxor.u32 %v58_v6, %v56_v7  ;;  %v57_v10 = vxor.u32 %v55_v8, %v53_v3  ;;  %p269_p3 = pnand %p268_p2, %p262_p13 }
  0x2b   :  { %v61_v11 = vshrl.u32 %v59_v9, 15  ;;  %v60_v12 = vxor.u32 %v58_v6, %v57_v10 }
  0x2d   :  { %v63_v13 = vxor.u32 %v61_v11, %v59_v9  ;;  %v62_v14 = vshrl.u32 %v60_v12, 15 }
  0x2f   :  { %v65_v15 = vmul.u32 739982445, %v63_v13  ;;  %v64_v16 = vxor.u32 %v62_v14, %v60_v12 }
  0x31   :  { %v67_v17 = vshrl.u32 %v65_v15, 12  ;;  %v66_v18 = vmul.u32 739982445, %v64_v16 }
  0x33   :  { %v69_v19 = vxor.u32 %v67_v17, %v65_v15  ;;  %v68_v20 = vshrl.u32 %v66_v18, 12 }
  0x35   :  { %v71_v21 = vmul.u32 695872825, %v69_v19  ;;  %v70_v22 = vxor.u32 %v68_v20, %v66_v18 }
  0x37   :  { %v73_v23 = vshrl.u32 %v71_v21, 15  ;;  %v72_v24 = vmul.u32 695872825, %v70_v22 }
  0x39   :  { %v75_v25 = vxor.u32 %v73_v23, %v71_v21  ;;  %v74_v26 = vshrl.u32 %v72_v24, 15 }
  0x3b   :  { %v77_v27 = vshrl.u32 %v75_v25, 8  ;;  %v76_v28 = vxor.u32 %v74_v26, %v72_v24 }
  0x3d   :  { %v79_v29 = vcvt.s32.f32 %v77_v27  ;;  %v78_v30 = vshrl.u32 %v76_v28, 8 }
  0x3f   :  { %v81_v31 = vmul.f32 1.1920929e-07, %v79_v29  ;;  %v80_v32 = vcvt.s32.f32 %v78_v30 }
  0x41   :  { %v330_v33 = vadd.f32 -0.99999994, %v81_v31  ;;  %v82_v34 = vmul.f32 1.1920929e-07, %v80_v32 }
  0x43   :  { %v85_v35 = vmul.f32 %v330_v33, %v330_v33  ;;  %v334_v36 = vadd.f32 -0.99999994, %v82_v34 }
  0x45   :  { %v87_v37 = vsub.f32 1.0, %v85_v35  ;;  %v86_v38 = vmul.f32 %v334_v36, %v334_v36 }
  0x47   :  { %219 = vlog2.f32 %v87_v37  ;;  %v88_v39 = vsub.f32 1.0, %v86_v38 }
  0x49   :  { %221 = vlog2.f32 %v88_v39 }
  0x51   :  { %v220_v40 = vpop.eup %219 }
  0x52   :  { %v90_v41 = vmul.f32 0.6931472, %v220_v40 }
  0x53   :  { %v222_v42 = vpop.eup %221 }
  0x54   :  { %v338_v43 = vsub.f32 0.0, %v90_v41  ;;  %v92_v44 = vmul.f32 0.6931472, %v222_v42 }
  0x56   :  { %v341_v45 = vadd.f32 -2.5, %v338_v43  ;;  %223 = vrsqrt.f32 %v338_v43  ;;  %v344_v46 = vsub.f32 0.0, %v92_v44  ;;  %vm131_vm0 = vcmp.eq.f32.partialorder %v338_v43, inf }
  0x57   :  { %v134_v57 = vand.u32 2147483648, %v338_v43  ;;  %vm133_vm1 = vcmp.eq.f32.partialorder %v338_v43, 0.0  ;;  %vm177_vm4 = vcmp.lt.f32.partialorder %v338_v43, 5.0 }
  0x58   :  { %v97_v47 = vmul.f32 2.8102264e-08, %v341_v45  ;;  %v348_v48 = vadd.f32 -2.5, %v344_v46  ;;  %225 = vrsqrt.f32 %v344_v46  ;;  %vm138_vm2 = vcmp.eq.f32.partialorder %v344_v46, inf }
  0x59   :  { %v141_v0 = vand.u32 2147483648, %v344_v46  ;;  %vm140_vm3 = vcmp.eq.f32.partialorder %v344_v46, 0.0  ;;  %vm178_vm5 = vcmp.lt.f32.partialorder %v344_v46, 5.0 }
  0x5a   :  { %v99_v49 = vadd.f32 3.4327394e-07, %v97_v47  ;;  %v98_v50 = vmul.f32 2.8102264e-08, %v348_v48 }
  0x5c   :  { %v101_v51 = vmul.f32 %v341_v45, %v99_v49  ;;  %v100_v52 = vadd.f32 3.4327394e-07, %v98_v50 }
  0x5e   :  { %v103_v53 = vadd.f32 -3.5233877e-06, %v101_v51  ;;  %v102_v54 = vmul.f32 %v348_v48, %v100_v52 }
  0x60   :  { %v224_v55 = vpop.eup %223  ;;  %v105_v56 = vmul.f32 %v341_v45, %v103_v53  ;;  %v104_v59 = vadd.f32 -3.5233877e-06, %v102_v54 }
  0x61   :  { %v130_v58 = vmul.f32 %v224_v55, %v338_v43 }
  0x62   :  { %v107_v60 = vadd.f32 -4.3915065e-06, %v105_v56  ;;  %v226_v61 = vpop.eup %225  ;;  %v106_v63 = vmul.f32 %v348_v48, %v104_v59 }
  0x63   :  { %v132_v62 = vsel %vm131_vm0, %v338_v43, %v130_v58  ;;  %v137_v3 = vmul.f32 %v226_v61, %v344_v46 }
  0x64   :  { %v109_v1 = vmul.f32 %v341_v45, %v107_v60  ;;  %v135_v2 = vsel %vm133_vm1, %v134_v57, %v132_v62  ;;  %v108_v5 = vadd.f32 -4.3915065e-06, %v106_v63 }
  0x65   :  { %v214_v4 = vadd.f32 -3.0, %v135_v2  ;;  %v139_v7 = vsel %vm138_vm2, %v344_v46, %v137_v3  ;;  %v185_v2 = vstv %s211_s0 }
  0x66   :  { %v111_v6 = vadd.f32 0.00021858087, %v109_v1  ;;  %v110_v9 = vmul.f32 %v348_v48, %v108_v5  ;;  %v142_v10 = vsel %vm140_vm3, %v141_v0, %v139_v7  ;;  %v188_v5 = vstv %s41_s2 }
  0x67   :  { %v145_v8 = vmul.f32 -0.00020021426, %v214_v4  ;;  %v215_v12 = vadd.f32 -3.0, %v142_v10  ;;  %v184_v10 = vld [vmem:[#allocation7 + $0x8] sm:$0xff] }
  0x68   :  { %v113_v11 = vmul.f32 %v341_v45, %v111_v6  ;;  %v112_v14 = vadd.f32 0.00021858087, %v110_v9 }
  0x69   :  { %v147_v13 = vadd.f32 0.00010095056, %v145_v8  ;;  %v146_v15 = vmul.f32 -0.00020021426, %v215_v12 }
  0x6a   :  { %v115_v16 = vadd.f32 -0.001253725, %v113_v11  ;;  %v114_v18 = vmul.f32 %v348_v48, %v112_v14 }
  0x6b   :  { %v149_v17 = vmul.f32 %v214_v4, %v147_v13  ;;  %v148_v19 = vadd.f32 0.00010095056, %v146_v15 }
  0x6c   :  { %v116_v21 = vadd.f32 -0.001253725, %v114_v18  ;;  %v117_v23 = vmul.f32 %v341_v45, %v115_v16 }
  0x6d   :  { %v151_v20 = vadd.f32 0.0013493432, %v149_v17  ;;  %v150_v22 = vmul.f32 %v215_v12, %v148_v19 }
  0x6e   :  { %v118_v27 = vmul.f32 %v348_v48, %v116_v21  ;;  %v119_v29 = vadd.f32 -0.0041776816, %v117_v23 }
  0x6f   :  { %v153_v24 = vmul.f32 %v214_v4, %v151_v20  ;;  %v152_v25 = vadd.f32 0.0013493432, %v150_v22 }
  0x70   :  { %v120_v34 = vadd.f32 -0.0041776816, %v118_v27  ;;  %v121_v37 = vmul.f32 %v341_v45, %v119_v29 }
  0x71   :  { %v155_v26 = vadd.f32 -0.0036734284, %v153_v24  ;;  %v154_v28 = vmul.f32 %v215_v12, %v152_v25 }
  0x72   :  { %v122_v41 = vmul.f32 %v348_v48, %v120_v34  ;;  %v123_v44 = vadd.f32 0.24664073, %v121_v37 }
  0x73   :  { %v157_v30 = vmul.f32 %v214_v4, %v155_v26  ;;  %v156_v31 = vadd.f32 -0.0036734284, %v154_v28 }
  0x74   :  { %v124_v51 = vadd.f32 0.24664073, %v122_v41  ;;  %v125_v53 = vmul.f32 %v341_v45, %v123_v44 }
  0x75   :  { %v159_v32 = vadd.f32 0.0057395077, %v157_v30  ;;  %v158_v35 = vmul.f32 %v215_v12, %v156_v31 }
  0x76   :  { %v126_v57 = vmul.f32 %v348_v48, %v124_v51  ;;  %v127_v59 = vadd.f32 1.5014094, %v125_v53  ;;  %v183_v48 = vld [vmem:[#allocation7] sm:$0xff] }
  0x77   :  { %v161_v38 = vmul.f32 %v214_v4, %v159_v32  ;;  %v160_v39 = vadd.f32 0.0057395077, %v158_v35 }
  0x78   :  { %v128_v63 = vadd.f32 1.5014094, %v126_v57 }
  0x79   :  { %v163_v40 = vadd.f32 -0.0076224613, %v161_v38  ;;  %v162_v42 = vmul.f32 %v215_v12, %v160_v39 }
  0x7b   :  { %v165_v47 = vmul.f32 %v214_v4, %v163_v40  ;;  %v164_v49 = vadd.f32 -0.0076224613, %v162_v42 }
  0x7d   :  { %v167_v50 = vadd.f32 0.0094388705, %v165_v47  ;;  %v166_v52 = vmul.f32 %v215_v12, %v164_v49 }
  0x7f   :  { %v169_v54 = vmul.f32 %v214_v4, %v167_v50  ;;  %v168_v55 = vadd.f32 0.0094388705, %v166_v52 }
  0x81   :  { %v171_v56 = vadd.f32 1.001674, %v169_v54  ;;  %v170_v58 = vmul.f32 %v215_v12, %v168_v55 }
  0x83   :  { %v173_v60 = vmul.f32 %v214_v4, %v171_v56  ;;  %v172_v61 = vadd.f32 1.001674, %v170_v58 }
  0x85   :  { %v175_v62 = vadd.f32 2.8329768, %v173_v60  ;;  %v174_v0 = vmul.f32 %v215_v12, %v172_v61 }
  0x87   :  { %v179_v1 = vsel %vm177_vm4, %v127_v59, %v175_v62  ;;  %v176_v3 = vadd.f32 2.8329768, %v174_v0 }
  0x88   :  { %v181_v45 = vmul.f32 %v179_v1, %v330_v33 }
  0x89   :  { %v180_v7 = vsel %vm178_vm5, %v128_v63, %v176_v3 }
  0x8a   :  { %v186_v6 = vmul.f32 %v185_v2, %v181_v45  ;;  %v182_v8 = vmul.f32 %v180_v7, %v334_v36 }
  0x8c   :  { %v189_v4 = vadd.f32 %v188_v5, %v186_v6  ;;  %v187_v9 = vmul.f32 %v185_v2, %v182_v8 }
  0x8e   :  { %v191_v43 = vadd.f32 %v189_v4, %v183_v48  ;;  %v190_v11 = vadd.f32 %v188_v5, %v187_v9 }
  0x90   :  { %193 = vst [vmem:[#allocation8] sm:$0xff] %v191_v43  ;;  %v192_v12 = vadd.f32 %v190_v11, %v184_v10 }
  0x92   :  { %194 = vst [vmem:[#allocation8 + $0x8] sm:$0xff] %v192_v12 }
  0x93   :  { %272 = shalt.err (!%p269_p3)
}
  0x94   :  { %s273_s10 = scalar_lea.hbm %s395_s3, 256 }
  0x95   :  { %p274_p4 = scmp.ne.s32.totalorder %s395_s3, %s273_s10  ;;  %p277_p5 = scmp.lt.u32.totalorder %s273_s10, %s395_s3 }
  0x97   :  { %p279_p6 = pnand %p277_p5, %p274_p4 }
  0x99   :  { %282 = shalt.err (!%p279_p6)
}
  0x9a   :  { %204 = dma.vmem_to_hbm [thread:$0]  %s202_s6, 256, %s395_s3, [#allocation5]  }
  0x9b   :  { %287 = dma.done.wait [#allocation5], 256  }
  0x9c   :  { %288 = vsyncadd [#allocation5], 4294967040 }
  0x9d   :  { %208 = vsyncpa [#allocation4], 1 }
  0x9e   :  { %209 = vsyncpa [#allocation5], 1 }
  0x9f   :  { %210 = vsyncpa [#allocation6], 1 }

</bundles_post_ra>
